<compile_context>
chip_gen: v7x
topology: tpu7x:2x2x1
jax: 0.10.0
libtpu: 0.0.40
codegen_flags: <defaults>
</compile_context>

<pallas_src>
import functools

import jax
import jax.numpy as jnp
from jax.experimental import pallas as pl
from jax.experimental.pallas import tpu as pltpu

_MIB = 1024 * 1024


# ---------------------------------------------------------------------------
# Kernels
# ---------------------------------------------------------------------------
def _softmax_bwd_kernel(g_ref, y_ref, o_ref):
    """Fast path: full softmax axis (C) resident in the (tb, C, tn) block."""
    g = g_ref[...].astype(jnp.float32)
    y = y_ref[...].astype(jnp.float32)
    # Cross-sublane reduce over the softmax axis -> XLU slot (free filler next
    # to the VPU / load-store slots); the kernel stays HBM-bound.
    s = jnp.sum(g * y, axis=1, keepdims=True)
    o_ref[...] = (y * (g - s)).astype(o_ref.dtype)


def _sum_gy_kernel(g_ref, y_ref, s_ref, *, c_total, c_tile, need_mask):
    """Two-pass path, pass 1: accumulate s = sum_c g*y over C tiles (grid axis 2)."""
    @pl.when(pl.program_id(2) == 0)
    def _():
        s_ref[...] = jnp.zeros_like(s_ref)

    p = g_ref[...].astype(jnp.float32) * y_ref[...].astype(jnp.float32)
    if need_mask:  # final partial C tile: zero the padded (garbage) rows
        c0 = pl.program_id(2) * c_tile
        idx = jax.lax.broadcasted_iota(jnp.int32, p.shape, 1) + c0
        p = jnp.where(idx < c_total, p, 0.0)
    s_ref[...] += jnp.sum(p, axis=1, keepdims=True)


def _apply_kernel(g_ref, y_ref, s_ref, o_ref):
    """Two-pass path, pass 2: grad_input = y * (g - s) (s broadcast over C)."""
    g = g_ref[...].astype(jnp.float32)
    y = y_ref[...].astype(jnp.float32)
    o_ref[...] = (y * (g - s_ref[...])).astype(o_ref.dtype)


# ---------------------------------------------------------------------------
# Generation-aware budgets / tiling policy
# ---------------------------------------------------------------------------
def _vmem_capacity_bytes():
    try:
        info = pltpu.get_tpu_info()
        for name in ("vmem_capacity_bytes", "vmem_size_bytes", "vmem_bytes"):
            v = getattr(info, name, None)
            if v:
                return int(v)
    except Exception:
        pass
    return 64 * _MIB  # conservative default (v7x-class)


def _has_two_tensorcores():
    # Only v7x-class chips have 2 TensorCores per chip; CORE_PARALLEL is the
    # only dimension semantic measured to change codegen for megacore sharding.
    try:
        kind = jax.devices()[0].device_kind.lower()
    except Exception:
        return False
    return ("v7" in kind) or ("7x" in kind)


def _budgets(vmem_phys):
    """VMEM budgets (bytes).

    total : cap on (6 I/O pipeline buffers + in-kernel f32 temporaries)
    target: preferred per-array I/O block size (amortizes the ~0.35us/step
            grid overhead against the generation's HBM bandwidth)
    floor : never shrink a block below this just to create pipeline steps
    """
    if vmem_phys >= 96 * _MIB:     # v5e / v6e: 128 MiB physical VMEM
        total, target, floor = 80 * _MIB, 8 * _MIB, 2 * _MIB
    else:                          # v7x-class: 64 MiB physical, 3.2 TB/s HBM
        total, target, floor = 44 * _MIB, 6 * _MIB, 4 * _MIB
    # Safety for unexpectedly small VMEM (older generations / emulators).
    total = min(total, max(8 * _MIB, (vmem_phys * 2) // 3))
    target = min(target, max(1 * _MIB, total // 8))
    floor = min(floor, target)
    return {"total": total, "target": target, "floor": floor}


def _vmem_limit(block_elems, bpe, vmem_phys):
    # 6 I/O buffers (3 arrays x double buffering) + ~3 f32 in-kernel temps,
    # plus compiler slack; never more than physical VMEM.
    cost = 6 * bpe + 12
    limit = block_elems * cost + 8 * _MIB
    limit = max(limit, 32 * _MIB)              # v5e's scoped default is only 16 MiB
    return int(min(limit, vmem_phys - 4 * _MIB))


def _choose_single_pass_tiles(B, C, N, bpe, budgets):
    """Pick (tb, tn) for block_shape=(tb, C, tn); None => needs the two-pass path."""
    cost = 6 * bpe + 12                       # VMEM bytes per element (bufs + f32 temps)
    e_vmem = budgets["total"] // cost         # max elements per block (VMEM)
    e_target = budgets["target"] // bpe       # preferred elements per block (step size)
    e_goal = max(1, min(e_vmem, e_target))

    if C * 128 > e_vmem:
        return None                           # even a (1, C, 128) slab does not fit

    if C * N <= e_goal:
        tn = N                                # full-N: lane layout trivially legal
        tb = max(1, min(B, e_goal // (C * N)))
    else:
        # Split lanes: tn a multiple of 128 so only the final tile is masked.
        tn = (min(N, max(128, e_goal // C)) // 128) * 128
        tb = 1

    def steps(tb_, tn_):
        return pl.cdiv(B, tb_) * pl.cdiv(N, tn_)

    def blk_bytes(tb_, tn_):
        return tb_ * C * tn_ * bpe

    # Create a little pipeline depth (>= ~4 steps, 2 per TensorCore on v7x),
    # shrinking tb first, then splitting tn — but never below the block floor.
    while tb > 1 and steps(tb, tn) < 4 and blk_bytes((tb + 1) // 2, tn) >= budgets["floor"]:
        tb = (tb + 1) // 2
    while steps(tb, tn) < 4:
        tn2 = ((tn // 2) // 128) * 128
        if tn2 >= 128 and blk_bytes(tb, tn2) >= budgets["floor"]:
            tn = tn2
        else:
            break
    return tb, tn


def _choose_two_pass_tiles(B, C, N, bpe, budgets):
    """Pick (tb, tc, tn) for the C-tiled two-pass path (very large C)."""
    cost = 6 * bpe + 12
    e_goal = max(8 * 128, min(budgets["total"] // cost, budgets["target"] // bpe))
    tn = N if N <= 1024 else 1024                       # 1024 is a multiple of 128
    tc = max(8, min(((e_goal // tn) // 8) * 8, (C // 8) * 8))
    if tc >= C:
        tc = C
    return 1, tc, tn


# ---------------------------------------------------------------------------
# Dispatch paths
# ---------------------------------------------------------------------------
def _softmax_backward_xla(g, y):
    # Narrow-lane (N < 128) fallback: masked vst + 128/N VMEM padding make the
    # Pallas path inefficient; plain XLA is already at the HBM roofline here.
    gf = g.astype(jnp.float32)
    yf = y.astype(jnp.float32)
    s = jnp.sum(gf * yf, axis=1, keepdims=True)
    return (yf * (gf - s)).astype(g.dtype)


def _softmax_backward_single_pass(g, y, tb, tn, vmem_phys):
    B, C, N = g.shape
    bpe = jnp.dtype(g.dtype).itemsize
    nb, nn = pl.cdiv(B, tb), pl.cdiv(N, tn)
    spec = pl.BlockSpec((tb, C, tn), lambda b, n: (b, 0, n))
    limit = _vmem_limit(tb * C * tn, bpe, vmem_phys)

    def run(use_core_parallel):
        par = getattr(pltpu, "PARALLEL", "parallel")
        sems = [par, par]
        if use_core_parallel:
            # Shard the larger grid axis across the 2 TensorCores on v7x.
            sems[0 if nb >= nn else 1] = getattr(pltpu, "CORE_PARALLEL", par)
        return pl.pallas_call(
            _softmax_bwd_kernel,
            out_shape=jax.ShapeDtypeStruct((B, C, N), g.dtype),
            grid_spec=pltpu.PrefetchScalarGridSpec(
                num_scalar_prefetch=0,
                grid=(nb, nn),
                in_specs=[spec, spec],
                out_specs=spec,
            ),
            compiler_params=pltpu.CompilerParams(
                dimension_semantics=tuple(sems),
                vmem_limit_bytes=limit,
            ),
        )(g, y)

    if _has_two_tensorcores():
        try:
            return run(True)
        except Exception:
            pass  # toolchain without CORE_PARALLEL support: retry plain parallel
    return run(False)


def _softmax_backward_two_pass(g, y, tb, tc, tn, vmem_phys):
    B, C, N = g.shape
    dtype = g.dtype
    bpe = jnp.dtype(dtype).itemsize
    nb, nn, nc = pl.cdiv(B, tb), pl.cdiv(N, tn), pl.cdiv(C, tc)
    gy_spec = pl.BlockSpec((tb, tc, tn), lambda b, n, k: (b, k, n))
    s_spec = pl.BlockSpec((tb, 1, tn), lambda b, n, k: (b, 0, n))
    limit = _vmem_limit(tb * tc * tn, bpe, vmem_phys)

    # Pass 1: s[b, 0, n] = sum_c g*y. C tiles on the innermost "arbitrary" axis;
    # the s output block is resident in VMEM across it (accumulator pattern).
    sum_kernel = functools.partial(
        _sum_gy_kernel, c_total=C, c_tile=tc, need_mask=(C % tc != 0))
    s = pl.pallas_call(
        sum_kernel,
        out_shape=jax.ShapeDtypeStruct((B, 1, N), jnp.float32),
        grid_spec=pltpu.PrefetchScalarGridSpec(
            num_scalar_prefetch=0,
            grid=(nb, nn, nc),
            in_specs=[gy_spec, gy_spec],
            out_specs=s_spec,
        ),
        compiler_params=pltpu.CompilerParams(
            dimension_semantics=("parallel", "parallel", "arbitrary"),
            vmem_limit_bytes=limit,
        ),
    )(g, y)

    # Pass 2: grad_input = y * (g - s); pure elementwise, all axes independent.
    # TODO(synk): shard the leading axis with pltpu.CORE_PARALLEL on v7x once verified.
    return pl.pallas_call(
        _apply_kernel,
        out_shape=jax.ShapeDtypeStruct((B, C, N), dtype),
        grid_spec=pltpu.PrefetchScalarGridSpec(
            num_scalar_prefetch=0,
            grid=(nb, nn, nc),
            in_specs=[gy_spec, gy_spec, s_spec],
            out_specs=gy_spec,
        ),
        compiler_params=pltpu.CompilerParams(
            dimension_semantics=("parallel", "parallel", "parallel"),
            vmem_limit_bytes=limit,
        ),
    )(g, y, s)


# ---------------------------------------------------------------------------
# Public entry point
# ---------------------------------------------------------------------------
def softmax_backward(grad_output: jax.Array, output: jax.Array, *, _tiles=None) -> jax.Array:
    """grad_input = output * (grad_output - sum(grad_output*output, dim=1, keepdim=True)).

    _tiles: optional (tb, tc, tn) override (testing); tc < C forces the two-pass
            C-tiled path, tc is None (or >= C) the single-pass fast path.
    """
    assert grad_output.shape == output.shape and grad_output.ndim == 3
    assert grad_output.dtype == output.dtype
    assert grad_output.dtype in (jnp.float32, jnp.bfloat16)
    B, C, N = grad_output.shape
    bpe = jnp.dtype(grad_output.dtype).itemsize

    if _tiles is None and N < 128:
        return _softmax_backward_xla(grad_output, output)

    vmem_phys = _vmem_capacity_bytes()
    budgets = _budgets(vmem_phys)

    if _tiles is not None:
        tb, tc, tn = _tiles
        tc = C if tc is None else tc
        tb, tc, tn = max(1, min(tb, B)), max(1, min(tc, C)), max(1, min(tn, N))
    else:
        single = _choose_single_pass_tiles(B, C, N, bpe, budgets)
        if single is None:
            tb, tc, tn = _choose_two_pass_tiles(B, C, N, bpe, budgets)
        else:
            (tb, tn), tc = single, C

    if tc < C:
        return _softmax_backward_two_pass(grad_output, output, tb, tc, tn, vmem_phys)
    return _softmax_backward_single_pass(grad_output, output, tb, tn, vmem_phys)


# ---------------------------------------------------------------------------
# Self-test
# ---------------------------------------------------------------------------
if __name__ == "__main__":
    key = jax.random.PRNGKey(0)

    def make_case(k, shape, dtype):
        k1, k2 = jax.random.split(k)
        logits = jax.random.normal(k1, shape, dtype=jnp.float32)
        y = jax.nn.softmax(logits, axis=1).astype(dtype)       # softmax over dim=1
        g = jax.random.normal(k2, shape, dtype=jnp.float32).astype(dtype)
        return g, y

    def reference(g, y):
        gf, yf = g.astype(jnp.float32), y.astype(jnp.float32)
        return yf * (gf - jnp.sum(gf * yf, axis=1, keepdims=True))

    cases = [
        # (name, shape, dtype, tile override, tolerance)
        ("f32 lane-dense single-pass", (2, 8, 256), jnp.float32, None, 1e-5),
        ("f32 narrow-N xla fallback", (2, 8, 32), jnp.float32, None, 1e-5),
        ("bf16 single-pass", (2, 16, 384), jnp.bfloat16, None, 2e-2),
        ("f32 ragged final lane tile", (2, 8, 320), jnp.float32, (1, None, 128), 1e-5),
        ("f32 C-tiled two-pass", (2, 12, 256), jnp.float32, (1, 8, 256), 1e-5),
    ]

    for i, (name, shape, dtype, tiles, tol) in enumerate(cases):
        g, y = make_case(jax.random.fold_in(key, i), shape, dtype)
        out = softmax_backward(g, y, _tiles=tiles)
        jax.block_until_ready(out)
        ref = reference(g, y)
        ok = jnp.allclose(out.astype(jnp.float32), ref, atol=tol, rtol=tol)
        assert bool(ok), f"mismatch vs reference in case: {name}"

    print("KERNEL_OK")
</pallas_src>

<mosaic_0001>
module attributes {stable_mosaic.version = 11 : i64} {
  func.func @_softmax_bwd_kernel(%arg0: i32, %arg1: i32, %arg2: memref<2x8x256xf32, #tpu.memory_space<vmem>>, %arg3: memref<2x8x256xf32, #tpu.memory_space<vmem>>, %arg4: memref<2x8x256xf32, #tpu.memory_space<vmem>>) attributes {dimension_semantics = [#tpu.dimension_semantics<parallel>, #tpu.dimension_semantics<parallel>], iteration_bounds = array<i64: 1, 1>, scalar_prefetch = 0 : i64, scratch_operands = 0 : i64, tpu.core_type = #tpu.core_type<tc>, window_params = [{transform_indices = @transform_0, window_bounds = array<i64: 2, 8, 256>}, {transform_indices = @transform_1, window_bounds = array<i64: 2, 8, 256>}, {transform_indices = @transform_2, window_bounds = array<i64: 2, 8, 256>}]} {
    %c0 = arith.constant 0 : index
    %c0_0 = arith.constant 0 : index
    %c0_1 = arith.constant 0 : index
    %0 = vector.load %arg2[%c0, %c0_0, %c0_1] : memref<2x8x256xf32, #tpu.memory_space<vmem>>, vector<2x8x256xf32>
    %c0_2 = arith.constant 0 : index
    %c0_3 = arith.constant 0 : index
    %c0_4 = arith.constant 0 : index
    %1 = vector.load %arg3[%c0_2, %c0_3, %c0_4] : memref<2x8x256xf32, #tpu.memory_space<vmem>>, vector<2x8x256xf32>
    %2 = arith.mulf %0, %1 : vector<2x8x256xf32>
    %cst = arith.constant dense<0.000000e+00> : vector<2x256xf32>
    %3 = vector.multi_reduction <add>, %2, %cst [1] : vector<2x8x256xf32> to vector<2x256xf32>
    %4 = vector.shape_cast %3 : vector<2x256xf32> to vector<2x1x256xf32>
    %5 = vector.broadcast %4 : vector<2x1x256xf32> to vector<2x8x256xf32>
    %6 = arith.subf %0, %5 : vector<2x8x256xf32>
    %7 = arith.mulf %1, %6 : vector<2x8x256xf32>
    %c0_5 = arith.constant 0 : index
    %c0_6 = arith.constant 0 : index
    %c0_7 = arith.constant 0 : index
    %8 = vector.load %arg4[%c0_5, %c0_6, %c0_7] : memref<2x8x256xf32, #tpu.memory_space<vmem>>, vector<2x8x256xf32>
    tpu.vector_store %arg4[%c0_5, %c0_6, %c0_7], %7 {strides = array<i32>} : memref<2x8x256xf32, #tpu.memory_space<vmem>>, vector<2x8x256xf32>,
    return
  }
  func.func @transform_0(%arg0: i32, %arg1: i32) -> (i32, i32, i32) {
    %c0_i32 = arith.constant 0 : i32
    %c0_i32_0 = arith.constant 0 : i32
    return %arg0, %c0_i32, %arg1 : i32, i32, i32
  }
  func.func @transform_1(%arg0: i32, %arg1: i32) -> (i32, i32, i32) {
    %c0_i32 = arith.constant 0 : i32
    %c0_i32_0 = arith.constant 0 : i32
    return %arg0, %c0_i32, %arg1 : i32, i32, i32
  }
  func.func @transform_2(%arg0: i32, %arg1: i32) -> (i32, i32, i32) {
    %c0_i32 = arith.constant 0 : i32
    %c0_i32_0 = arith.constant 0 : i32
    return %arg0, %c0_i32, %arg1 : i32, i32, i32
  }
}

</mosaic_0001>

<bundles_post_ra>
// kernel: tpu_custom_call.1
= control target key start
LH: loop header
LB: loop body
LE: loop exit
PB: predicated region body
PF: predicated region fallthrough
CT: control target
= control target key end

     0   :  { %7 = vsyncpa [#allocation3], 0  ;;  %s248_s0 = inlined_call_operand.hbm [shape: f32[2,8,256], index: 0, kind: input, shape index: {}]   ;;  %s249_s1 = inlined_call_operand.hbm [shape: f32[2,8,256], index: 1, kind: input, shape index: {}]   ;;  %s250_s2 = inlined_call_operand.hbm [shape: f32[2,8,256], index: 2, kind: output, shape index: {}]  }
   0x1   :  { %8 = vsyncpa [#allocation6], 0 }
   0x2   :  { %9 = vsyncpa [#allocation4], 0  ;;  %s183_s9 = smov [#allocation2]   ;;  %s111_s13 = scalar_lea.hbm %s248_s0, 512 }
   0x3   :  { %s15_s10 = sshll.u32 %s183_s9, 4  ;;  %p112_p0 = scmp.ne.s32.totalorder %s248_s0, %s111_s13  ;;  %s16_s10 = int_to_ptr.vmem [resolvable:$true] %s15_s10 }
   0x4   :  { %p115_p1 = scmp.lt.u32.totalorder %s111_s13, %s248_s0 }
   0x6   :  { %p117_p2 = pnand %p115_p1, %p112_p0 }
   0x8   :  { %120 = shalt.err (!%p117_p2)
}
   0x9   :  { %s121_s18 = scalar_lea.vmem %s16_s10, 512  ;;  %p126_p4 = scmp.lt.s32.totalorder %s16_s10, %s16_s10 }
   0xa   :  { %p122_p3 = scmp.ne.s32.totalorder %s16_s10, %s121_s18  ;;  %p127_p5 = scmp.lt.s32.totalorder %s121_s18, %s121_s18 }
   0xc   :  { %p128_p6 = por %p127_p5, %p126_p4 }
   0xe   :  { %p129_p7 = pnand %p128_p6, %p122_p3 }
  0x10   :  { %132 = shalt.err (!%p129_p7)
}
  0x11   :  { %s184_s19 = smov 256   ;;  %s185_s20 = smov 16  }
  0x12   :  { %21 = dma.hbm_to_vmem [thread:$0]  %s248_s0, 512, %s16_s10, [#allocation3], %s184_s19, %s184_s19, %s185_s20  }
  0x13   :  { %s186_s23 = smov [#allocation5]   ;;  %s133_s27 = scalar_lea.hbm %s249_s1, 512 }
  0x14   :  { %s27_s24 = sshll.u32 %s186_s23, 4  ;;  %p134_p8 = scmp.ne.s32.totalorder %s249_s1, %s133_s27  ;;  %s28_s24 = int_to_ptr.vmem [resolvable:$true] %s27_s24 }
  0x15   :  { %p137_p9 = scmp.lt.u32.totalorder %s133_s27, %s249_s1 }
  0x17   :  { %p139_p10 = pnand %p137_p9, %p134_p8 }
  0x19   :  { %142 = shalt.err (!%p139_p10)
}
  0x1a   :  { %s143_s4 = scalar_lea.vmem %s28_s24, 512  ;;  %p148_p12 = scmp.lt.s32.totalorder %s28_s24, %s28_s24 }
  0x1b   :  { %p144_p11 = scmp.ne.s32.totalorder %s28_s24, %s143_s4  ;;  %p149_p13 = scmp.lt.s32.totalorder %s143_s4, %s143_s4 }
  0x1d   :  { %p150_p0 = por %p149_p13, %p148_p12 }
  0x1f   :  { %p151_p1 = pnand %p150_p0, %p144_p11 }
  0x21   :  { %154 = shalt.err (!%p151_p1)
}
  0x22   :  { %33 = dma.hbm_to_vmem [thread:$0]  %s249_s1, 512, %s28_s24, [#allocation6], %s184_s19, %s184_s19, %s185_s20  }
  0x23   :  { %177 = dma.done.wait [#allocation3], 512  }
  0x24   :  { %178 = vsyncadd [#allocation3], 4294966784 }
  0x25   :  { %179 = dma.done.wait [#allocation6], 512  }
  0x26   :  { %180 = vsyncadd [#allocation6], 4294966784  ;;  %v40_v0 = vld [vmem:[#allocation2] sm:$0xff]  ;;  %v41_v2 = vld [vmem:[#allocation2 + $0x8] sm:$0xff]  ;;  %s187_s1 = smov [#allocation7]  }
  0x27   :  { %v44_v1 = vld [vmem:[#allocation5] sm:$0xff]  ;;  %v45_v4 = vld [vmem:[#allocation5 + $0x8] sm:$0xff]  ;;  %v42_v5 = vld [vmem:[#allocation2 + $0x10] sm:$0xff]  ;;  %s93_s6 = sshll.u32 %s187_s1, 4  ;;  %s94_s6 = int_to_ptr.vmem [resolvable:$true] %s93_s6 }
  0x28   :  { %v48_v3 = vmul.f32 %v44_v1, %v40_v0  ;;  %v46_v6 = vld [vmem:[#allocation5 + $0x10] sm:$0xff]  ;;  %v49_v7 = vmul.f32 %v45_v4, %v41_v2  ;;  %v43_v9 = vld [vmem:[#allocation2 + $0x18] sm:$0xff]  ;;  %s155_s7 = scalar_lea.vmem %s94_s6, 512  ;;  %p160_p3 = scmp.lt.s32.totalorder %s94_s6, %s94_s6 }
  0x29   :  { %v50_v8 = vmul.f32 %v46_v6, %v42_v5  ;;  %v47_v10 = vld [vmem:[#allocation5 + $0x18] sm:$0xff]  ;;  %p156_p2 = scmp.ne.s32.totalorder %s94_s6, %s155_s7  ;;  %p161_p4 = scmp.lt.s32.totalorder %s155_s7, %s155_s7 }
  0x2a   :  { %v52_v11 = vrot.slane %v48_v3, 4  ;;  %v51_v12 = vmul.f32 %v47_v10, %v43_v9  ;;  %v58_v13 = vrot.slane %v49_v7, 4 }
  0x2b   :  { %v64_v14 = vrot.slane %v50_v8, 4  ;;  %p162_p5 = por %p161_p4, %p160_p3 }
  0x2c   :  { %v53_v15 = vadd.f32 %v52_v11, %v48_v3  ;;  %v70_v16 = vrot.slane %v51_v12, 4  ;;  %v59_v17 = vadd.f32 %v58_v13, %v49_v7 }
  0x2d   :  { %v65_v18 = vadd.f32 %v64_v14, %v50_v8  ;;  %p163_p6 = pnand %p162_p5, %p156_p2 }
  0x2e   :  { %v54_v19 = vrot.slane %v53_v15, 2  ;;  %v71_v20 = vadd.f32 %v70_v16, %v51_v12  ;;  %v60_v21 = vrot.slane %v59_v17, 2 }
  0x2f   :  { %v66_v22 = vrot.slane %v65_v18, 2 }
  0x30   :  { %v55_v23 = vadd.f32 %v54_v19, %v53_v15  ;;  %v72_v24 = vrot.slane %v71_v20, 2  ;;  %v61_v25 = vadd.f32 %v60_v21, %v59_v17 }
  0x31   :  { %v67_v26 = vadd.f32 %v66_v22, %v65_v18 }
  0x32   :  { %v56_v27 = vrot.slane %v55_v23, 1  ;;  %v73_v28 = vadd.f32 %v72_v24, %v71_v20  ;;  %v62_v29 = vrot.slane %v61_v25, 1 }
  0x33   :  { %v68_v30 = vrot.slane %v67_v26, 1 }
  0x34   :  { %v57_v31 = vadd.f32 %v56_v27, %v55_v23  ;;  %v74_v32 = vrot.slane %v73_v28, 1  ;;  %v63_v33 = vadd.f32 %v62_v29, %v61_v25 }
  0x35   :  { %v69_v34 = vadd.f32 %v68_v30, %v67_v26 }
  0x36   :  { %v76_v35 = vsub.f32 %v40_v0, %v57_v31  ;;  %v75_v36 = vadd.f32 %v74_v32, %v73_v28  ;;  %v77_v37 = vsub.f32 %v41_v2, %v63_v33 }
  0x37   :  { %v78_v38 = vsub.f32 %v42_v5, %v69_v34 }
  0x38   :  { %v80_v39 = vmul.f32 %v76_v35, %v44_v1  ;;  %v79_v40 = vsub.f32 %v43_v9, %v75_v36  ;;  %v81_v41 = vmul.f32 %v77_v37, %v45_v4 }
  0x39   :  { %v82_v42 = vmul.f32 %v78_v38, %v46_v6 }
  0x3a   :  { %84 = vst [vmem:[#allocation7] sm:$0xff] %v80_v39  ;;  %v83_v43 = vmul.f32 %v79_v40, %v47_v10  ;;  %85 = vst [vmem:[#allocation7 + $0x8] sm:$0xff] %v81_v41 }
  0x3b   :  { %86 = vst [vmem:[#allocation7 + $0x10] sm:$0xff] %v82_v42 }
  0x3c   :  { %87 = vst [vmem:[#allocation7 + $0x18] sm:$0xff] %v83_v43 }
  0x3d   :  { %166 = shalt.err (!%p163_p6)
}
  0x3e   :  { %s167_s10 = scalar_lea.hbm %s250_s2, 512 }
  0x3f   :  { %p168_p7 = scmp.ne.s32.totalorder %s250_s2, %s167_s10  ;;  %p171_p8 = scmp.lt.u32.totalorder %s167_s10, %s250_s2 }
  0x41   :  { %p173_p9 = pnand %p171_p8, %p168_p7 }
  0x43   :  { %176 = shalt.err (!%p173_p9)
}
  0x44   :  { %99 = dma.vmem_to_hbm [thread:$0]  %s94_s6, 512, %s250_s2, [#allocation4], %s184_s19, %s184_s19, %s185_s20  }
  0x45   :  { %181 = dma.done.wait [#allocation4], 512  }
  0x46   :  { %182 = vsyncadd [#allocation4], 4294966784 }
  0x47   :  { %103 = vsyncpa [#allocation3], 1 }
  0x48   :  { %104 = vsyncpa [#allocation6], 1 }
  0x49   :  { %105 = vsyncpa [#allocation4], 1 }

</bundles_post_ra>
